<compile_context>
chip_gen: v5e
topology: v5e:2x2
jax: 0.10.0
libtpu: 0.0.40
codegen_flags: <defaults>
</compile_context>

<pallas_src>
import functools

import jax
import jax.numpy as jnp
from jax import lax
from jax.experimental import pallas as pl
from jax.experimental.pallas import tpu as pltpu


def _gelu(x):
    # TODO(synk): torch.nn.GELU default is the exact erf form; the tanh
    # approximation is used here for guaranteed Mosaic (EUP) lowering.
    return jax.nn.gelu(x, approximate=True)


# --------------------------- single fused kernel ----------------------------------
def _lmgsc_fused_kernel(
        # scalar prefetch (SMEM)
        ptr_ref,                                    # (B+1,) int32   graphs.ptr
        # per-graph blocked inputs (VMEM)
        et_ref, ht_ref, tt_ref,                     # (E_g,1) int32  edge / head / tail type
        src_ref,                                    # (E_g,1) int32  local source node id
        tgt_ref,                                    # (1,E_g) int32  local target node id (row layout)
        lm_ref,                                     # (1,H_lm) f32   lm_context row of this graph
        # parameters (VMEM, grid-invariant blocks -> fetched once)
        ee_w1_ref, ee_b1_ref, ee_w2_ref, ee_b2_ref,  # edge encoder MLP(F->H->1)
        ctx_w_ref,                                   # ctx scorer Linear(H_lm,1) weight
        gs_w1_ref, gs_b1_ref, gs_w2_ref,             # graph scorer MLP(1->32->1)
        out_bias_ref,                                # (1,1) = ctx_b + gs_b2 folded host-side
        # output
        out_ref,                                     # (1,1) qa_score of this graph
        *, hops, n_per_graph, num_node_types, num_edge_types):
    b = pl.program_id(0)
    e_g = et_ref.shape[0]
    n_g = n_per_graph
    feat_dim = num_edge_types + 2 * num_node_types

    # ---- edge encoder: sigmoid(MLP(concat one-hots)) ------------------------------
    # feat[e,j] = [j==edge_type[e]] | [j==Te+head_type[e]] | [j==Te+Tn+tail_type[e]]
    col = lax.broadcasted_iota(jnp.int32, (e_g, feat_dim), 1)
    feat = ((col == et_ref[...])
            | (col == ht_ref[...] + num_edge_types)
            | (col == tt_ref[...] + num_edge_types + num_node_types)
            ).astype(jnp.bfloat16)                   # one-hot values are exact in bf16
    h = jnp.dot(feat, ee_w1_ref[...], preferred_element_type=jnp.float32) + ee_b1_ref[...]
    h = _gelu(h)
    logit = jnp.dot(h, ee_w2_ref[...], preferred_element_type=jnp.float32) + ee_b2_ref[...]
    edge_emb = jax.nn.sigmoid(logit)                 # (E_g, 1)

    # ---- GSC message passing: `hops` rounds, aggr='add' ---------------------------
    # gather matrix  S [e,n] = [src[e]==n]   (E_g, N_g)
    # scatter matrix Tt[n,e] = [tgt[e]==n]   (N_g, E_g)   built directly (no transpose)
    gather_oh = (lax.broadcasted_iota(jnp.int32, (e_g, n_g), 1)
                 == src_ref[...]).astype(jnp.bfloat16)
    scatter_oh = (lax.broadcasted_iota(jnp.int32, (n_g, e_g), 0)
                  == tgt_ref[...]).astype(jnp.bfloat16)
    aggr = jnp.zeros((n_g, 1), jnp.float32)          # node_emb starts as zeros(N,1)
    for _ in range(hops):                            # hops is static -> unrolled
        msg = jnp.dot(gather_oh, aggr, preferred_element_type=jnp.float32) + edge_emb
        aggr = jnp.dot(scatter_oh, msg, preferred_element_type=jnp.float32)

    # ---- pick this graph's context node: local index = ptr[b] - b*N_g -------------
    ctx_local = ptr_ref[b] - b * n_g
    row_ids = lax.broadcasted_iota(jnp.int32, (n_g, 1), 0)
    graph_emb = jnp.sum(jnp.where(row_ids == ctx_local, aggr, 0.0),
                        axis=0, keepdims=True)       # (1, 1)

    # ---- scorers -------------------------------------------------------------------
    ctx_score = jnp.dot(lm_ref[...], ctx_w_ref[...],
                        preferred_element_type=jnp.float32)          # (1,1)
    gh = graph_emb * gs_w1_ref[...] + gs_b1_ref[...]                 # Linear(1,32): K=1 matmul as broadcast
    gh = _gelu(gh)                                                   # dropout(0.2) = eval identity
    graph_score = jnp.dot(gh, gs_w2_ref[...], preferred_element_type=jnp.float32)
    out_ref[...] = ctx_score + graph_score + out_bias_ref[...]


# ------------------------------------ wrapper --------------------------------------
def lmgsc_forward(params, node_type, edge_index, edge_type, ptr, lm_context,
                  *, hops, num_node_types, num_edge_types):
    """LMGSC.forward: one fused Pallas call, grid over graphs of the PyG Batch."""
    n_nodes = node_type.shape[0]
    n_edges = edge_type.shape[0]
    batch = ptr.shape[0] - 1
    n_per_graph = n_nodes // batch
    e_per_graph = n_edges // batch
    # TODO(synk): assumes a PyG Batch with equal node/edge counts per graph and edges
    # grouped by graph; ragged batches need per-graph counts (pl.BoundedSlice tiles).

    i32 = jnp.int32
    src = edge_index[0].astype(i32)
    tgt = edge_index[1].astype(i32)
    # O(E)/O(N) int32 glue only -- no dense one-hot / incidence matrices in HBM.
    head_type = node_type[src].astype(i32)
    tail_type = node_type[tgt].astype(i32)
    graph_of_edge = src // n_per_graph
    src_local = src - graph_of_edge * n_per_graph
    tgt_local = tgt - graph_of_edge * n_per_graph

    et = edge_type.astype(i32).reshape(batch, e_per_graph, 1)
    ht = head_type.reshape(batch, e_per_graph, 1)
    tt = tail_type.reshape(batch, e_per_graph, 1)
    sl = src_local.reshape(batch, e_per_graph, 1)
    tl = tgt_local.reshape(batch, 1, e_per_graph)
    lm = lm_context.astype(jnp.float32).reshape(batch, 1, -1)
    ptr_i = ptr.astype(i32)

    out_bias = params["ctx_b"] + params["gs_b2"]       # fold the two additive scalars

    feat_dim = num_edge_types + 2 * num_node_types
    hidden = params["ee_w1"].shape[1]
    lm_hidden = lm_context.shape[1]

    def per_graph(d1, d2):
        return pl.BlockSpec((None, d1, d2), lambda b, ptr_ref: (b, 0, 0))

    def grid_invariant(shape):
        zeros = (0,) * len(shape)
        return pl.BlockSpec(shape, lambda b, ptr_ref: zeros)

    kernel = functools.partial(
        _lmgsc_fused_kernel, hops=hops, n_per_graph=n_per_graph,
        num_node_types=num_node_types, num_edge_types=num_edge_types)

    out = pl.pallas_call(
        kernel,
        out_shape=jax.ShapeDtypeStruct((batch, 1, 1), jnp.float32),
        grid_spec=pltpu.PrefetchScalarGridSpec(
            num_scalar_prefetch=1,                     # graphs.ptr -> SMEM
            grid=(batch,),
            in_specs=[
                per_graph(e_per_graph, 1),             # edge_type
                per_graph(e_per_graph, 1),             # head node type
                per_graph(e_per_graph, 1),             # tail node type
                per_graph(e_per_graph, 1),             # src local index (column layout)
                per_graph(1, e_per_graph),             # tgt local index (row layout)
                per_graph(1, lm_hidden),               # lm_context row
                grid_invariant((feat_dim, hidden)),    # ee_w1
                grid_invariant((1, hidden)),           # ee_b1
                grid_invariant((hidden, 1)),           # ee_w2
                grid_invariant((1, 1)),                # ee_b2
                grid_invariant((lm_hidden, 1)),        # ctx_w
                grid_invariant((1, 32)),               # gs_w1
                grid_invariant((1, 32)),               # gs_b1
                grid_invariant((32, 1)),               # gs_w2
                grid_invariant((1, 1)),                # out_bias (ctx_b + gs_b2)
            ],
            out_specs=pl.BlockSpec((None, 1, 1), lambda b, ptr_ref: (b, 0, 0)),
        ),
        compiler_params=pltpu.CompilerParams(
            # batch axis shards across v7x's 2 TensorCores; free on v5e/v6e.
            dimension_semantics=("parallel",),
            # explicit budget, sized well under v7x's 64 MiB physical VMEM.
            vmem_limit_bytes=32 * 1024 * 1024,
        ),
    )(ptr_i, et, ht, tt, sl, tl, lm,
      params["ee_w1"], params["ee_b1"], params["ee_w2"], params["ee_b2"],
      params["ctx_w"],
      params["gs_w1"], params["gs_b1"], params["gs_w2"],
      out_bias)
    return out.reshape(batch, 1)


# ----------------------------- pure-JAX reference ----------------------------------
def lmgsc_reference(params, node_type, edge_index, edge_type, ptr, lm_context,
                    *, hops, num_node_types, num_edge_types):
    n_nodes = node_type.shape[0]
    edge_vec = jax.nn.one_hot(edge_type, num_edge_types, dtype=jnp.float32)
    head_vec = jax.nn.one_hot(node_type[edge_index[0]], num_node_types, dtype=jnp.float32)
    tail_vec = jax.nn.one_hot(node_type[edge_index[1]], num_node_types, dtype=jnp.float32)
    feat = jnp.concatenate([edge_vec, head_vec, tail_vec], axis=1)
    h = jax.nn.gelu(feat @ params["ee_w1"] + params["ee_b1"], approximate=True)
    edge_emb = jax.nn.sigmoid(h @ params["ee_w2"] + params["ee_b2"])
    aggr = jnp.zeros((n_nodes, 1), jnp.float32)
    for _ in range(hops):
        msg = aggr[edge_index[0]] + edge_emb
        aggr = jnp.zeros((n_nodes, 1), jnp.float32).at[edge_index[1]].add(msg)
    graph_emb = aggr[ptr[:-1]]
    ctx_score = lm_context @ params["ctx_w"] + params["ctx_b"]
    gh = jax.nn.gelu(graph_emb @ params["gs_w1"] + params["gs_b1"], approximate=True)
    graph_score = gh @ params["gs_w2"] + params["gs_b2"]
    return ctx_score + graph_score


# --------------------------- deterministic parameter init --------------------------
def init_params(key, *, num_node_types, num_edge_types, gsc_hidden_size, lm_hidden_size):
    def linear(k, fan_in, fan_out):
        kw, kb = jax.random.split(k)
        bound = 1.0 / jnp.sqrt(jnp.float32(fan_in))
        w = jax.random.uniform(kw, (fan_in, fan_out), jnp.float32, -bound, bound)
        b = jax.random.uniform(kb, (1, fan_out), jnp.float32, -bound, bound)
        return w, b

    k = jax.random.split(key, 5)
    f_in = num_edge_types + 2 * num_node_types
    ee_w1, ee_b1 = linear(k[0], f_in, gsc_hidden_size)   # edge_encoder MLP layer 0
    ee_w2, ee_b2 = linear(k[1], gsc_hidden_size, 1)      # edge_encoder MLP layer 1
    ctx_w, ctx_b = linear(k[2], lm_hidden_size, 1)       # ctx_scorer
    gs_w1, gs_b1 = linear(k[3], 1, 32)                   # graph_scorer MLP layer 0
    gs_w2, gs_b2 = linear(k[4], 32, 1)                   # graph_scorer MLP layer 1
    return dict(ee_w1=ee_w1, ee_b1=ee_b1, ee_w2=ee_w2, ee_b2=ee_b2,
                ctx_w=ctx_w, ctx_b=ctx_b,
                gs_w1=gs_w1, gs_b1=gs_b1, gs_w2=gs_w2, gs_b2=gs_b2)


if __name__ == "__main__":
    HOPS = 3
    NUM_NODE_TYPES = 4
    NUM_EDGE_TYPES = 5
    GSC_HIDDEN = 32
    LM_HIDDEN = 32
    BATCH = 2
    NODES_PER_GRAPH = 8
    EDGES_PER_GRAPH = 12

    key = jax.random.PRNGKey(0)
    k_param, k_nt, k_et, k_src, k_tgt, k_ctx = jax.random.split(key, 6)

    params = init_params(k_param, num_node_types=NUM_NODE_TYPES,
                         num_edge_types=NUM_EDGE_TYPES,
                         gsc_hidden_size=GSC_HIDDEN, lm_hidden_size=LM_HIDDEN)

    N = BATCH * NODES_PER_GRAPH
    E = BATCH * EDGES_PER_GRAPH

    node_type = jax.random.randint(k_nt, (N,), 0, NUM_NODE_TYPES)
    edge_type = jax.random.randint(k_et, (E,), 0, NUM_EDGE_TYPES)

    # edges stay within their own graph (PyG Batch semantics)
    graph_of_edge = jnp.repeat(jnp.arange(BATCH), EDGES_PER_GRAPH)
    src_local = jax.random.randint(k_src, (E,), 0, NODES_PER_GRAPH)
    tgt_local = jax.random.randint(k_tgt, (E,), 0, NODES_PER_GRAPH)
    edge_index = jnp.stack([src_local + graph_of_edge * NODES_PER_GRAPH,
                            tgt_local + graph_of_edge * NODES_PER_GRAPH], axis=0)  # (2, E)

    ptr = jnp.arange(BATCH + 1) * NODES_PER_GRAPH                 # graphs.ptr
    lm_context = jax.random.normal(k_ctx, (BATCH, LM_HIDDEN), jnp.float32)

    qa_score = lmgsc_forward(params, node_type, edge_index, edge_type, ptr, lm_context,
                             hops=HOPS, num_node_types=NUM_NODE_TYPES,
                             num_edge_types=NUM_EDGE_TYPES)
    qa_score = jax.block_until_ready(qa_score)
    assert qa_score.shape == (BATCH, 1)

    ref = lmgsc_reference(params, node_type, edge_index, edge_type, ptr, lm_context,
                          hops=HOPS, num_node_types=NUM_NODE_TYPES,
                          num_edge_types=NUM_EDGE_TYPES)
    max_err = float(jnp.max(jnp.abs(qa_score - ref)))
    # loose tolerance: XLA's default f32 matmul precision on TPU may differ from the MXU path
    assert max_err < 5e-2, f"mismatch vs pure-JAX reference: {max_err}"

    print("KERNEL_OK")
</pallas_src>

<mosaic_0001>
module attributes {stable_mosaic.version = 11 : i64} {
  func.func @_lmgsc_fused_kernel(%arg0: i32, %arg1: memref<3xi32, #tpu.memory_space<smem>>, %arg2: memref<1x12x1xi32, #tpu.memory_space<vmem>>, %arg3: memref<1x12x1xi32, #tpu.memory_space<vmem>>, %arg4: memref<1x12x1xi32, #tpu.memory_space<vmem>>, %arg5: memref<1x12x1xi32, #tpu.memory_space<vmem>>, %arg6: memref<1x1x12xi32, #tpu.memory_space<vmem>>, %arg7: memref<1x1x32xf32, #tpu.memory_space<vmem>>, %arg8: memref<13x32xf32, #tpu.memory_space<vmem>>, %arg9: memref<1x32xf32, #tpu.memory_space<vmem>>, %arg10: memref<32x1xf32, #tpu.memory_space<vmem>>, %arg11: memref<1x1xf32, #tpu.memory_space<vmem>>, %arg12: memref<32x1xf32, #tpu.memory_space<vmem>>, %arg13: memref<1x32xf32, #tpu.memory_space<vmem>>, %arg14: memref<1x32xf32, #tpu.memory_space<vmem>>, %arg15: memref<32x1xf32, #tpu.memory_space<vmem>>, %arg16: memref<1x1xf32, #tpu.memory_space<vmem>>, %arg17: memref<1x1x1xf32, #tpu.memory_space<vmem>>) attributes {dimension_semantics = [#tpu.dimension_semantics<parallel>], iteration_bounds = array<i64: 2>, scalar_prefetch = 1 : i64, scratch_operands = 0 : i64, tpu.core_type = #tpu.core_type<tc>, window_params = [{transform_indices = @transform_0, window_bounds = array<i64: 1, 12, 1>}, {transform_indices = @transform_1, window_bounds = array<i64: 1, 12, 1>}, {transform_indices = @transform_2, window_bounds = array<i64: 1, 12, 1>}, {transform_indices = @transform_3, window_bounds = array<i64: 1, 12, 1>}, {transform_indices = @transform_4, window_bounds = array<i64: 1, 1, 12>}, {transform_indices = @transform_5, window_bounds = array<i64: 1, 1, 32>}, {pipeline_mode = #tpu.pipeline_mode<synchronous>, transform_indices = @transform_6, window_bounds = array<i64: 13, 32>}, {pipeline_mode = #tpu.pipeline_mode<synchronous>, transform_indices = @transform_7, window_bounds = array<i64: 1, 32>}, {pipeline_mode = #tpu.pipeline_mode<synchronous>, transform_indices = @transform_8, window_bounds = array<i64: 32, 1>}, {pipeline_mode = #tpu.pipeline_mode<synchronous>, transform_indices = @transform_9, window_bounds = array<i64: 1, 1>}, {pipeline_mode = #tpu.pipeline_mode<synchronous>, transform_indices = @transform_10, window_bounds = array<i64: 32, 1>}, {pipeline_mode = #tpu.pipeline_mode<synchronous>, transform_indices = @transform_11, window_bounds = array<i64: 1, 32>}, {pipeline_mode = #tpu.pipeline_mode<synchronous>, transform_indices = @transform_12, window_bounds = array<i64: 1, 32>}, {pipeline_mode = #tpu.pipeline_mode<synchronous>, transform_indices = @transform_13, window_bounds = array<i64: 32, 1>}, {pipeline_mode = #tpu.pipeline_mode<synchronous>, transform_indices = @transform_14, window_bounds = array<i64: 1, 1>}, {transform_indices = @transform_15, window_bounds = array<i64: 1, 1, 1>}]} {
    %0 = tpu.iota {dimensions = array<i32: 1>} : vector<12x13xi32>
    %c0 = arith.constant 0 : index
    %c0_0 = arith.constant 0 : index
    %c0_1 = arith.constant 0 : index
    %1 = vector.load %arg2[%c0, %c0_0, %c0_1] : memref<1x12x1xi32, #tpu.memory_space<vmem>>, vector<1x12x1xi32>
    %2 = vector.shape_cast %1 : vector<1x12x1xi32> to vector<12x1xi32>
    %3 = vector.broadcast %2 : vector<12x1xi32> to vector<12x13xi32>
    %4 = arith.cmpi eq, %0, %3 : vector<12x13xi32>
    %c0_2 = arith.constant 0 : index
    %c0_3 = arith.constant 0 : index
    %c0_4 = arith.constant 0 : index
    %5 = vector.load %arg3[%c0_2, %c0_3, %c0_4] : memref<1x12x1xi32, #tpu.memory_space<vmem>>, vector<1x12x1xi32>
    %6 = vector.shape_cast %5 : vector<1x12x1xi32> to vector<12x1xi32>
    %c5_i32 = arith.constant 5 : i32
    %7 = vector.broadcast %c5_i32 : i32 to vector<12x1xi32>
    %8 = arith.addi %6, %7 : vector<12x1xi32>
    %9 = vector.broadcast %8 : vector<12x1xi32> to vector<12x13xi32>
    %10 = arith.cmpi eq, %0, %9 : vector<12x13xi32>
    %11 = arith.ori %4, %10 : vector<12x13xi1>
    %c0_5 = arith.constant 0 : index
    %c0_6 = arith.constant 0 : index
    %c0_7 = arith.constant 0 : index
    %12 = vector.load %arg4[%c0_5, %c0_6, %c0_7] : memref<1x12x1xi32, #tpu.memory_space<vmem>>, vector<1x12x1xi32>
    %13 = vector.shape_cast %12 : vector<1x12x1xi32> to vector<12x1xi32>
    %c5_i32_8 = arith.constant 5 : i32
    %14 = vector.broadcast %c5_i32_8 : i32 to vector<12x1xi32>
    %15 = arith.addi %13, %14 : vector<12x1xi32>
    %c4_i32 = arith.constant 4 : i32
    %16 = vector.broadcast %c4_i32 : i32 to vector<12x1xi32>
    %17 = arith.addi %15, %16 : vector<12x1xi32>
    %18 = vector.broadcast %17 : vector<12x1xi32> to vector<12x13xi32>
    %19 = arith.cmpi eq, %0, %18 : vector<12x13xi32>
    %20 = arith.ori %11, %19 : vector<12x13xi1>
    %21 = arith.extui %20 : vector<12x13xi1> to vector<12x13xi32>
    %22 = arith.sitofp %21 : vector<12x13xi32> to vector<12x13xf32>
    %23 = arith.truncf %22 : vector<12x13xf32> to vector<12x13xbf16>
    %c0_9 = arith.constant 0 : index
    %c0_10 = arith.constant 0 : index
    %24 = vector.load %arg8[%c0_9, %c0_10] : memref<13x32xf32, #tpu.memory_space<vmem>>, vector<13x32xf32>
    %cst = arith.constant dense<0.000000e+00> : vector<12x32xf32>
    %25 = tpu.matmul %23, %24, %cst {dimension_numbers = #tpu.dot_dimension_numbers<[1], [0], [0], [1], [0, 0, 1, 1], [], []>} : vector<12x13xbf16>, vector<13x32xf32>, vector<12x32xf32> -> vector<12x32xf32>
    %c0_11 = arith.constant 0 : index
    %c0_12 = arith.constant 0 : index
    %26 = vector.load %arg9[%c0_11, %c0_12] : memref<1x32xf32, #tpu.memory_space<vmem>>, vector<1x32xf32>
    %27 = vector.broadcast %26 : vector<1x32xf32> to vector<12x32xf32>
    %28 = arith.addf %25, %27 : vector<12x32xf32>
    %29 = arith.mulf %28, %28 : vector<12x32xf32>
    %30 = arith.mulf %28, %29 : vector<12x32xf32>
    %cst_13 = arith.constant 4.471500e-02 : f32
    %31 = vector.broadcast %cst_13 : f32 to vector<12x32xf32>
    %32 = arith.mulf %31, %30 : vector<12x32xf32>
    %33 = arith.addf %28, %32 : vector<12x32xf32>
    %cst_14 = arith.constant 0.797884583 : f32
    %34 = vector.broadcast %cst_14 : f32 to vector<12x32xf32>
    %35 = arith.mulf %34, %33 : vector<12x32xf32>
    %36 = math.tanh %35 : vector<12x32xf32>
    %cst_15 = arith.constant 1.000000e+00 : f32
    %37 = vector.broadcast %cst_15 : f32 to vector<12x32xf32>
    %38 = arith.addf %37, %36 : vector<12x32xf32>
    %cst_16 = arith.constant 5.000000e-01 : f32
    %39 = vector.broadcast %cst_16 : f32 to vector<12x32xf32>
    %40 = arith.mulf %39, %38 : vector<12x32xf32>
    %41 = arith.mulf %28, %40 : vector<12x32xf32>
    %c0_17 = arith.constant 0 : index
    %c0_18 = arith.constant 0 : index
    %42 = vector.load %arg10[%c0_17, %c0_18] : memref<32x1xf32, #tpu.memory_space<vmem>>, vector<32x1xf32>
    %cst_19 = arith.constant dense<0.000000e+00> : vector<12x1xf32>
    %43 = tpu.matmul %41, %42, %cst_19 {dimension_numbers = #tpu.dot_dimension_numbers<[1], [0], [0], [1], [0, 0, 1, 1], [], []>} : vector<12x32xf32>, vector<32x1xf32>, vector<12x1xf32> -> vector<12x1xf32>
    %c0_20 = arith.constant 0 : index
    %c0_21 = arith.constant 0 : index
    %44 = vector.load %arg11[%c0_20, %c0_21] : memref<1x1xf32, #tpu.memory_space<vmem>>, vector<1x1xf32>
    %45 = vector.broadcast %44 : vector<1x1xf32> to vector<12x1xf32>
    %46 = arith.addf %43, %45 : vector<12x1xf32>
    %47 = arith.negf %46 : vector<12x1xf32>
    %48 = math.exp %47 : vector<12x1xf32>
    %cst_22 = arith.constant 1.000000e+00 : f32
    %49 = vector.broadcast %cst_22 : f32 to vector<12x1xf32>
    %50 = arith.addf %49, %48 : vector<12x1xf32>
    %51 = arith.divf %49, %50 : vector<12x1xf32>
    %52 = tpu.iota {dimensions = array<i32: 1>} : vector<12x8xi32>
    %c0_23 = arith.constant 0 : index
    %c0_24 = arith.constant 0 : index
    %c0_25 = arith.constant 0 : index
    %53 = vector.load %arg5[%c0_23, %c0_24, %c0_25] : memref<1x12x1xi32, #tpu.memory_space<vmem>>, vector<1x12x1xi32>
    %54 = vector.shape_cast %53 : vector<1x12x1xi32> to vector<12x1xi32>
    %55 = vector.broadcast %54 : vector<12x1xi32> to vector<12x8xi32>
    %56 = arith.cmpi eq, %52, %55 : vector<12x8xi32>
    %57 = arith.extui %56 : vector<12x8xi1> to vector<12x8xi32>
    %58 = arith.sitofp %57 : vector<12x8xi32> to vector<12x8xf32>
    %59 = arith.truncf %58 : vector<12x8xf32> to vector<12x8xbf16>
    %60 = tpu.iota {dimensions = array<i32: 0>} : vector<8x12xi32>
    %c0_26 = arith.constant 0 : index
    %c0_27 = arith.constant 0 : index
    %c0_28 = arith.constant 0 : index
    %61 = vector.load %arg6[%c0_26, %c0_27, %c0_28] : memref<1x1x12xi32, #tpu.memory_space<vmem>>, vector<1x1x12xi32>
    %62 = vector.shape_cast %61 : vector<1x1x12xi32> to vector<1x12xi32>
    %63 = vector.broadcast %62 : vector<1x12xi32> to vector<8x12xi32>
    %64 = arith.cmpi eq, %60, %63 : vector<8x12xi32>
    %65 = arith.extui %64 : vector<8x12xi1> to vector<8x12xi32>
    %66 = arith.sitofp %65 : vector<8x12xi32> to vector<8x12xf32>
    %67 = arith.truncf %66 : vector<8x12xf32> to vector<8x12xbf16>
    %cst_29 = arith.constant 0.000000e+00 : f32
    %68 = vector.broadcast %cst_29 : f32 to vector<8x1xf32>
    %cst_30 = arith.constant dense<0.000000e+00> : vector<12x1xf32>
    %69 = tpu.matmul %59, %68, %cst_30 {dimension_numbers = #tpu.dot_dimension_numbers<[1], [0], [0], [1], [0, 0, 1, 1], [], []>} : vector<12x8xbf16>, vector<8x1xf32>, vector<12x1xf32> -> vector<12x1xf32>
    %70 = arith.addf %69, %51 : vector<12x1xf32>
    %cst_31 = arith.constant dense<0.000000e+00> : vector<8x1xf32>
    %71 = tpu.matmul %67, %70, %cst_31 {dimension_numbers = #tpu.dot_dimension_numbers<[1], [0], [0], [1], [0, 0, 1, 1], [], []>} : vector<8x12xbf16>, vector<12x1xf32>, vector<8x1xf32> -> vector<8x1xf32>
    %cst_32 = arith.constant dense<0.000000e+00> : vector<12x1xf32>
    %72 = tpu.matmul %59, %71, %cst_32 {dimension_numbers = #tpu.dot_dimension_numbers<[1], [0], [0], [1], [0, 0, 1, 1], [], []>} : vector<12x8xbf16>, vector<8x1xf32>, vector<12x1xf32> -> vector<12x1xf32>
    %73 = arith.addf %72, %51 : vector<12x1xf32>
    %cst_33 = arith.constant dense<0.000000e+00> : vector<8x1xf32>
    %74 = tpu.matmul %67, %73, %cst_33 {dimension_numbers = #tpu.dot_dimension_numbers<[1], [0], [0], [1], [0, 0, 1, 1], [], []>} : vector<8x12xbf16>, vector<12x1xf32>, vector<8x1xf32> -> vector<8x1xf32>
    %cst_34 = arith.constant dense<0.000000e+00> : vector<12x1xf32>
    %75 = tpu.matmul %59, %74, %cst_34 {dimension_numbers = #tpu.dot_dimension_numbers<[1], [0], [0], [1], [0, 0, 1, 1], [], []>} : vector<12x8xbf16>, vector<8x1xf32>, vector<12x1xf32> -> vector<12x1xf32>
    %76 = arith.addf %75, %51 : vector<12x1xf32>
    %cst_35 = arith.constant dense<0.000000e+00> : vector<8x1xf32>
    %77 = tpu.matmul %67, %76, %cst_35 {dimension_numbers = #tpu.dot_dimension_numbers<[1], [0], [0], [1], [0, 0, 1, 1], [], []>} : vector<8x12xbf16>, vector<12x1xf32>, vector<8x1xf32> -> vector<8x1xf32>
    %78 = arith.index_cast %arg0 : i32 to index
    %79 = memref.load %arg1[%78] : memref<3xi32, #tpu.memory_space<smem>>
    %c8_i32 = arith.constant 8 : i32
    %80 = arith.muli %arg0, %c8_i32 : i32
    %81 = arith.subi %79, %80 : i32
    %82 = tpu.iota {dimensions = array<i32: 0>} : vector<8x1xi32>
    %83 = vector.broadcast %81 : i32 to vector<8x1xi32>
    %84 = arith.cmpi eq, %82, %83 : vector<8x1xi32>
    %cst_36 = arith.constant 0.000000e+00 : f32
    %85 = vector.broadcast %cst_36 : f32 to vector<8x1xf32>
    %86 = arith.select %84, %77, %85 : vector<8x1xi1>, vector<8x1xf32>
    %cst_37 = arith.constant dense<0.000000e+00> : vector<1xf32>
    %87 = vector.multi_reduction <add>, %86, %cst_37 [0] : vector<8x1xf32> to vector<1xf32>
    %88 = vector.shape_cast %87 : vector<1xf32> to vector<1x1xf32>
    %c0_38 = arith.constant 0 : index
    %c0_39 = arith.constant 0 : index
    %c0_40 = arith.constant 0 : index
    %89 = vector.load %arg7[%c0_38, %c0_39, %c0_40] : memref<1x1x32xf32, #tpu.memory_space<vmem>>, vector<1x1x32xf32>
    %90 = vector.shape_cast %89 : vector<1x1x32xf32> to vector<1x32xf32>
    %c0_41 = arith.constant 0 : index
    %c0_42 = arith.constant 0 : index
    %91 = vector.load %arg12[%c0_41, %c0_42] : memref<32x1xf32, #tpu.memory_space<vmem>>, vector<32x1xf32>
    %cst_43 = arith.constant dense<0.000000e+00> : vector<1x1xf32>
    %92 = tpu.matmul %90, %91, %cst_43 {dimension_numbers = #tpu.dot_dimension_numbers<[1], [0], [0], [1], [0, 0, 1, 1], [], []>} : vector<1x32xf32>, vector<32x1xf32>, vector<1x1xf32> -> vector<1x1xf32>
    %c0_44 = arith.constant 0 : index
    %c0_45 = arith.constant 0 : index
    %93 = vector.load %arg13[%c0_44, %c0_45] : memref<1x32xf32, #tpu.memory_space<vmem>>, vector<1x32xf32>
    %94 = vector.broadcast %88 : vector<1x1xf32> to vector<1x32xf32>
    %95 = arith.mulf %94, %93 : vector<1x32xf32>
    %c0_46 = arith.constant 0 : index
    %c0_47 = arith.constant 0 : index
    %96 = vector.load %arg14[%c0_46, %c0_47] : memref<1x32xf32, #tpu.memory_space<vmem>>, vector<1x32xf32>
    %97 = arith.addf %95, %96 : vector<1x32xf32>
    %98 = arith.mulf %97, %97 : vector<1x32xf32>
    %99 = arith.mulf %97, %98 : vector<1x32xf32>
    %cst_48 = arith.constant 4.471500e-02 : f32
    %100 = vector.broadcast %cst_48 : f32 to vector<1x32xf32>
    %101 = arith.mulf %100, %99 : vector<1x32xf32>
    %102 = arith.addf %97, %101 : vector<1x32xf32>
    %cst_49 = arith.constant 0.797884583 : f32
    %103 = vector.broadcast %cst_49 : f32 to vector<1x32xf32>
    %104 = arith.mulf %103, %102 : vector<1x32xf32>
    %105 = math.tanh %104 : vector<1x32xf32>
    %cst_50 = arith.constant 1.000000e+00 : f32
    %106 = vector.broadcast %cst_50 : f32 to vector<1x32xf32>
    %107 = arith.addf %106, %105 : vector<1x32xf32>
    %cst_51 = arith.constant 5.000000e-01 : f32
    %108 = vector.broadcast %cst_51 : f32 to vector<1x32xf32>
    %109 = arith.mulf %108, %107 : vector<1x32xf32>
    %110 = arith.mulf %97, %109 : vector<1x32xf32>
    %c0_52 = arith.constant 0 : index
    %c0_53 = arith.constant 0 : index
    %111 = vector.load %arg15[%c0_52, %c0_53] : memref<32x1xf32, #tpu.memory_space<vmem>>, vector<32x1xf32>
    %cst_54 = arith.constant dense<0.000000e+00> : vector<1x1xf32>
    %112 = tpu.matmul %110, %111, %cst_54 {dimension_numbers = #tpu.dot_dimension_numbers<[1], [0], [0], [1], [0, 0, 1, 1], [], []>} : vector<1x32xf32>, vector<32x1xf32>, vector<1x1xf32> -> vector<1x1xf32>
    %113 = arith.addf %92, %112 : vector<1x1xf32>
    %c0_55 = arith.constant 0 : index
    %c0_56 = arith.constant 0 : index
    %114 = vector.load %arg16[%c0_55, %c0_56] : memref<1x1xf32, #tpu.memory_space<vmem>>, vector<1x1xf32>
    %115 = arith.addf %113, %114 : vector<1x1xf32>
    %c0_57 = arith.constant 0 : index
    %c0_58 = arith.constant 0 : index
    %c0_59 = arith.constant 0 : index
    %116 = vector.load %arg17[%c0_57, %c0_58, %c0_59] : memref<1x1x1xf32, #tpu.memory_space<vmem>>, vector<1x1x1xf32>
    %117 = vector.shape_cast %116 : vector<1x1x1xf32> to vector<1x1xf32>
    %118 = vector.shape_cast %115 : vector<1x1xf32> to vector<1x1x1xf32>
    tpu.vector_store %arg17[%c0_57, %c0_58, %c0_59], %118 {strides = array<i32>} : memref<1x1x1xf32, #tpu.memory_space<vmem>>, vector<1x1x1xf32>,
    return
  }
  func.func @transform_0(%arg0: i32, %arg1: memref<3xi32, #tpu.memory_space<smem>>) -> (i32, i32, i32) {
    %c0_i32 = arith.constant 0 : i32
    %c0_i32_0 = arith.constant 0 : i32
    %c0_i32_1 = arith.constant 0 : i32
    return %arg0, %c0_i32, %c0_i32_0 : i32, i32, i32
  }
  func.func @transform_1(%arg0: i32, %arg1: memref<3xi32, #tpu.memory_space<smem>>) -> (i32, i32, i32) {
    %c0_i32 = arith.constant 0 : i32
    %c0_i32_0 = arith.constant 0 : i32
    %c0_i32_1 = arith.constant 0 : i32
    return %arg0, %c0_i32, %c0_i32_0 : i32, i32, i32
  }
  func.func @transform_2(%arg0: i32, %arg1: memref<3xi32, #tpu.memory_space<smem>>) -> (i32, i32, i32) {
    %c0_i32 = arith.constant 0 : i32
    %c0_i32_0 = arith.constant 0 : i32
    %c0_i32_1 = arith.constant 0 : i32
    return %arg0, %c0_i32, %c0_i32_0 : i32, i32, i32
  }
  func.func @transform_3(%arg0: i32, %arg1: memref<3xi32, #tpu.memory_space<smem>>) -> (i32, i32, i32) {
    %c0_i32 = arith.constant 0 : i32
    %c0_i32_0 = arith.constant 0 : i32
    %c0_i32_1 = arith.constant 0 : i32
    return %arg0, %c0_i32, %c0_i32_0 : i32, i32, i32
  }
  func.func @transform_4(%arg0: i32, %arg1: memref<3xi32, #tpu.memory_space<smem>>) -> (i32, i32, i32) {
    %c0_i32 = arith.constant 0 : i32
    %c0_i32_0 = arith.constant 0 : i32
    %c0_i32_1 = arith.constant 0 : i32
    return %arg0, %c0_i32, %c0_i32_0 : i32, i32, i32
  }
  func.func @transform_5(%arg0: i32, %arg1: memref<3xi32, #tpu.memory_space<smem>>) -> (i32, i32, i32) {
    %c0_i32 = arith.constant 0 : i32
    %c0_i32_0 = arith.constant 0 : i32
    %c0_i32_1 = arith.constant 0 : i32
    return %arg0, %c0_i32, %c0_i32_0 : i32, i32, i32
  }
  func.func @transform_6(%arg0: i32, %arg1: memref<3xi32, #tpu.memory_space<smem>>) -> (i32, i32) {
    %c0_i32 = arith.constant 0 : i32
    %c0_i32_0 = arith.constant 0 : i32
    %c0_i32_1 = arith.constant 0 : i32
    return %c0_i32, %c0_i32_0 : i32, i32
  }
  func.func @transform_7(%arg0: i32, %arg1: memref<3xi32, #tpu.memory_space<smem>>) -> (i32, i32) {
    %c0_i32 = arith.constant 0 : i32
    %c0_i32_0 = arith.constant 0 : i32
    %c0_i32_1 = arith.constant 0 : i32
    return %c0_i32, %c0_i32_0 : i32, i32
  }
  func.func @transform_8(%arg0: i32, %arg1: memref<3xi32, #tpu.memory_space<smem>>) -> (i32, i32) {
    %c0_i32 = arith.constant 0 : i32
    %c0_i32_0 = arith.constant 0 : i32
    %c0_i32_1 = arith.constant 0 : i32
    return %c0_i32, %c0_i32_0 : i32, i32
  }
  func.func @transform_9(%arg0: i32, %arg1: memref<3xi32, #tpu.memory_space<smem>>) -> (i32, i32) {
    %c0_i32 = arith.constant 0 : i32
    %c0_i32_0 = arith.constant 0 : i32
    %c0_i32_1 = arith.constant 0 : i32
    return %c0_i32, %c0_i32_0 : i32, i32
  }
  func.func @transform_10(%arg0: i32, %arg1: memref<3xi32, #tpu.memory_space<smem>>) -> (i32, i32) {
    %c0_i32 = arith.constant 0 : i32
    %c0_i32_0 = arith.constant 0 : i32
    %c0_i32_1 = arith.constant 0 : i32
    return %c0_i32, %c0_i32_0 : i32, i32
  }
  func.func @transform_11(%arg0: i32, %arg1: memref<3xi32, #tpu.memory_space<smem>>) -> (i32, i32) {
    %c0_i32 = arith.constant 0 : i32
    %c0_i32_0 = arith.constant 0 : i32
    %c0_i32_1 = arith.constant 0 : i32
    return %c0_i32, %c0_i32_0 : i32, i32
  }
  func.func @transform_12(%arg0: i32, %arg1: memref<3xi32, #tpu.memory_space<smem>>) -> (i32, i32) {
    %c0_i32 = arith.constant 0 : i32
    %c0_i32_0 = arith.constant 0 : i32
    %c0_i32_1 = arith.constant 0 : i32
    return %c0_i32, %c0_i32_0 : i32, i32
  }
  func.func @transform_13(%arg0: i32, %arg1: memref<3xi32, #tpu.memory_space<smem>>) -> (i32, i32) {
    %c0_i32 = arith.constant 0 : i32
    %c0_i32_0 = arith.constant 0 : i32
    %c0_i32_1 = arith.constant 0 : i32
    return %c0_i32, %c0_i32_0 : i32, i32
  }
  func.func @transform_14(%arg0: i32, %arg1: memref<3xi32, #tpu.memory_space<smem>>) -> (i32, i32) {
    %c0_i32 = arith.constant 0 : i32
    %c0_i32_0 = arith.constant 0 : i32
    %c0_i32_1 = arith.constant 0 : i32
    return %c0_i32, %c0_i32_0 : i32, i32
  }
  func.func @transform_15(%arg0: i32, %arg1: memref<3xi32, #tpu.memory_space<smem>>) -> (i32, i32, i32) {
    %c0_i32 = arith.constant 0 : i32
    %c0_i32_0 = arith.constant 0 : i32
    %c0_i32_1 = arith.constant 0 : i32
    return %arg0, %c0_i32, %c0_i32_0 : i32, i32, i32
  }
}

</mosaic_0001>

<bundles_post_ra>
// kernel: tpu_custom_call.1
= control target key start
LH: loop header
LB: loop body
LE: loop exit
PB: predicated region body
PF: predicated region fallthrough
CT: control target
= control target key end

     0   :  { %s1226_s28 = smov [#allocation3]   ;;  %s1450_s0 = inlined_call_operand.vmem [shape: s32[3], index: 0, kind: input, shape index: {}]   ;;  %s1451_s1 = inlined_call_operand.vmem [shape: s32[2,12,1], index: 1, kind: input, shape index: {}]   ;;  %s1452_s2 = inlined_call_operand.vmem [shape: s32[2,12,1], index: 2, kind: input, shape index: {}]   ;;  %s1453_s3 = inlined_call_operand.vmem [shape: s32[2,12,1], index: 3, kind: input, shape index: {}]   ;;  %s1454_s4 = inlined_call_operand.vmem [shape: s32[2,12,1], index: 4, kind: input, shape index: {}]   ;;  %s1455_s5 = inlined_call_operand.vmem [shape: s32[2,1,12], index: 5, kind: input, shape index: {}]   ;;  %s1456_s6 = inlined_call_operand.vmem [shape: f32[2,1,32], index: 6, kind: input, shape index: {}]   ;;  %s1457_s7 = inlined_call_operand.vmem [shape: f32[13,32], index: 7, kind: input, shape index: {}]   ;;  %s1458_s8 = inlined_call_operand.vmem [shape: f32[1,32], index: 8, kind: input, shape index: {}]   ;;  %s1459_s9 = inlined_call_operand.vmem [shape: f32[32,1], index: 9, kind: input, shape index: {}]   ;;  %s1460_s11 = inlined_call_operand.vmem [shape: f32[32,1], index: 11, kind: input, shape index: {}]   ;;  %s1461_s12 = inlined_call_operand.vmem [shape: f32[1,32], index: 12, kind: input, shape index: {}]   ;;  %s1462_s13 = inlined_call_operand.vmem [shape: f32[1,32], index: 13, kind: input, shape index: {}]   ;;  %s1463_s14 = inlined_call_operand.vmem [shape: f32[32,1], index: 14, kind: input, shape index: {}]   ;;  %s1464_s16 = inlined_call_operand.vmem [shape: f32[2,1,1], index: 16, kind: output, shape index: {}]   ;;  %s1465_s10 = inlined_call_operand.<no memory space> [shape: f32[1,1], index: 10, kind: input, shape index: {}]   ;;  %s1466_s15 = inlined_call_operand.<no memory space> [shape: f32[1,1], index: 15, kind: input, shape index: {}]  }
   0x1   :  { %1467 = sst [smem:[#allocation7_spill]] %s1450_s0  ;;  %v26_v0 = vstv %s1465_s10  ;;  %v28_v1 = vstv %s1466_s15 }
   0x2   :  { %1468 = sst [smem:[#allocation8_spill]] %s1456_s6  ;;  %27 = vst [vmem:[#allocation4] sm:$0x1] %v26_v0 }
   0x3   :  { %s1469_s23 = sld [smem:[#allocation7_spill]]  ;;  %29 = vst [vmem:[#allocation5] sm:$0x1] %v28_v1 }
   0x9   :  { %s22_s6 = sshll.u32 %s1469_s23, 4  ;;  %s23_s6 = int_to_ptr.vmem [resolvable:$true] %s22_s6 }
   0xa   :  { %25 = dma.vmem_to_smem %s23_s6, 16, %s1226_s28, [#allocation2] }
   0xb   :  { %1220 = dma.done.wait [#allocation2], 16 }
   0xc   :  { %1221 = vsyncadd [#allocation2], 4294967280 }
   0xd   :  { %32 = sfence }
   0xe   :  { %s1323_s29 = smov 0  }
   0xf LB: > { %s1329_s10 = sadd.s32 4294967295, %s1224_s29   ;;  %p1135_p0 = scmp.ge.s32.totalorder %s1224_s29, 1  ;;  %s1224_s29 = sphi %s1323_s29, %s38_s29  }
  0x10   : > { %p496_p1 = scmp.lt.s32.totalorder %s1224_s29, 3 }
  0x12   : > { %p497_p2 = pnand %p1135_p0, %p496_p1 }
  0x13   : > { %p563_p3 = scmp.lt.s32.totalorder (!%p497_p2), %s1329_s10, 1  ;;  %s939_s30 = sld [smem:[#allocation3 + %s1329_s10]] (!%p497_p2) }
  0x14   : > { %500 = sbr.rel (%p497_p2) target bundleno = 1427 (0x593), region = 80  ;;  %s1164_s0 = sshll.u32 (!%p497_p2), %s1329_s10, 3 }
  0x19   : > { %v1227_v2 = vmov 0   ;;  %s1335_s6 = scalar_select %p563_p3, %s1329_s10, 1  ;;  %v1228_v17 = vmov 0.0   ;;  %v640_v18 = vld [vmem:[%s1457_s7 + $0x8] sm:$0x1f]  ;;  %vm649_vm0 = vcmask 1044480   ;;  %v592_v20 = vlaneseq }
  0x1a   : > { %1184 = vset.pattern.permute.xlu0 %v1227_v2  ;;  %1185 = vset.pattern.permute.xlu1 %v1227_v2  ;;  %v639_v19 = vld [vmem:[%s1457_s7] sm:$0xff]  ;;  %vm645_vm11 = vcmask 105472   ;;  %vm792_vm14 = vcmask 64512   ;;  %v696_v36 = vld [vmem:[%s1459_s9 + $0x18] sm:$0xff]  ;;  %v695_v37 = vld [vmem:[%s1459_s9 + $0x10] sm:$0xff]  ;;  %vm701_vm15 = vcmask 261120  }
  0x1b   : > { %1186 = vset.pattern.permute.xlu2 %v1227_v2  ;;  %s1169_s15 = sshll.u32 %s1335_s6, 4  ;;  %811 = vmatpush.msra.mxu2 %v1228_v17  ;;  %v593_v23 = vand.u32 127, %v592_v20  ;;  %v694_v38 = vld [vmem:[%s1459_s9 + $0x8] sm:$0xff]  ;;  %v693_v39 = vld [vmem:[%s1459_s9] sm:$0xff]  ;;  %s585_s28 = scalar_lea.vmem %s1455_s5, %s1335_s6 }
  0x1c   : > { %s567_s17 = scalar_lea.vmem %s1451_s1, %s1169_s15  ;;  %s572_s20 = scalar_lea.vmem %s1452_s2, %s1169_s15  ;;  %1146 = vmatpush.msk.msra.mxu0 %vm649_vm0, %v640_v18  ;;  %720 = vmatpush.msra.mxu1 %v696_v36  ;;  %v1187_v40 = vld [vmem:[%s1458_s8] ss:$0 sm:$0xff]  ;;  %v785_v18 = vshrl.u32 %v592_v20, 7 }
  0x1d   : > { %v594_v3 = vld [vmem:[%s567_s17] sm:$0xff]  ;;  %s577_s23 = scalar_lea.vmem %s1453_s3, %s1169_s15  ;;  %v605_v9 = vld [vmem:[%s572_s20 + $0x8] sm:$0xf]  ;;  %s582_s26 = scalar_lea.vmem %s1454_s4, %s1169_s15 }
  0x1e   : > { %v604_v4 = vld [vmem:[%s572_s20] sm:$0xff]  ;;  %597 = vperm.xlu0 %1184, %v594_v3   ;;  %v619_v8 = vld [vmem:[%s577_s23 + $0x8] sm:$0xf]  ;;  %v607_v13 = vadd.s32 5, %v605_v9  ;;  %668 = vmatpush.msra.mxu0 %v639_v19  ;;  %s941_s15 = ssub.s32 %s939_s30, %s1164_s0 }
  0x1f   : > { %v606_v5 = vadd.s32 5, %v604_v4  ;;  %v618_v6 = vld [vmem:[%s577_s23] sm:$0xff]  ;;  %v595_v11 = vld [vmem:[%s567_s17 + $0x8] sm:$0xf]  ;;  %v621_v12 = vadd.s32 5, %v619_v8  ;;  %721 = vmatpush.msra.mxu1 %v695_v37  ;;  %s1472_s17 = sld [smem:[#allocation8_spill]] }
  0x20   : > { %v620_v7 = vadd.s32 5, %v618_v6  ;;  %v769_v15 = vld [vmem:[%s582_s26] sm:$0xff]  ;;  %v770_v16 = vld [vmem:[%s582_s26 + $0x8] sm:$0xf]  ;;  %s591_s26 = scalar_lea.vmem %s1464_s16, %s1335_s6 }
  0x21   : > { %609 = vperm.xlu1 %1185, %v606_v5   ;;  %v623_v14 = vadd.s32 4, %v621_v12  ;;  %722 = vmatpush.msra.mxu1 %v694_v38  ;;  %v1188_v63 = vld [vmem:[#allocation4] ss:$0 sm:$0xff] }
  0x22   : > { %v622_v10 = vadd.s32 4, %v620_v7  ;;  %v1189_v19 = vld [vmem:[%s585_s28] ss:$0 sm:$0xff] }
  0x23   : > { %723 = vmatpush.msra.mxu1 %v693_v39 }
  0x24   : > { %625 = vperm.xlu2 %1186, %v622_v10  }
  0x25   : > { %s588_s18 = scalar_lea.vmem %s1472_s17, %s1335_s6 }
  0x26   : > { %600 = vperm.xlu0 %1184, %v595_v11  }
  0x29   : > { %612 = vperm.xlu1 %1185, %v607_v13  }
  0x2c   : > { %628 = vperm.xlu2 %1186, %v623_v14  }
  0x2e   : > { %772 = vperm.xlu0 %1184, %v769_v15  }
  0x31   : > { %775 = vperm.xlu1 %1185, %v770_v16  }
  0x7e   : > { %v626_v21 = vpop.permute.xlu2 %625 }
  0x7f   : > { %vm630_vm3 = vcmp.eq.s32.totalorder %v593_v23, %v626_v21 }
  0x86   : > { %v629_v26 = vpop.permute.xlu2 %628 }
  0x87   : > { %vm631_vm8 = vcmp.eq.s32.totalorder %v593_v23, %v629_v26 }
  0x90   : > { %v598_v22 = vpop.permute.xlu0 %597 }
  0x91   : > { %vm602_vm1 = vcmp.eq.s32.totalorder %v593_v23, %v598_v22 }
  0x93   : > { %v610_v24 = vpop.permute.xlu1 %609 }
  0x94   : > { %vm614_vm2 = vcmp.eq.s32.totalorder %v593_v23, %v610_v24 }
  0x95   : > { %vm616_vm4 = vmor %vm602_vm1, %vm614_vm2 }
  0x96   : > { %vm632_vm5 = vmor %vm616_vm4, %vm630_vm3  ;;  %vm788_vm4 = vcmp.eq.s32.totalorder %v785_v18, %v1189_v19 }
  0x97   : > { %v1144_v28 = vsel %vm632_vm5, 1.0, %v1228_v17 }
  0x98   : > { %v601_v25 = vpop.permute.xlu0 %600 }
  0x99   : > { %vm603_vm6 = vcmp.eq.s32.totalorder %v593_v23, %v601_v25 }
  0x9b   : > { %v613_v27 = vpop.permute.xlu1 %612 }
  0x9c   : > { %vm615_vm7 = vcmp.eq.s32.totalorder %v593_v23, %v613_v27 }
  0x9d   : > { %vm617_vm9 = vmor %vm603_vm6, %vm615_vm7 }
  0x9e   : > { %vm633_vm10 = vmor %vm617_vm9, %vm631_vm8  ;;  %vm822_vm9 = vcmask 1043456  }
  0x9f   : > { %v1145_v29 = vsel %vm633_vm10, 1.0, %v1228_v17  ;;  %vm818_vm10 = vcmask 97280  }
  0xa0   : > { %v638_v30 = vpack.c.bf16 %v1145_v29, %v1144_v28  ;;  %v773_v31 = vpop.permute.xlu0 %772 }
  0xa1   : > { %vm777_vm12 = vcmp.eq.s32.totalorder %v593_v23, %v773_v31 }
  0xa2   : > { %1147 = vmatmul.msk.bf16.vlgmr.msra.gmra.mxu0 %vm645_vm11, %v638_v30  ;;  %v1152_v33 = vsel %vm777_vm12, 1.0, %v1228_v17  ;;  %vm945_vm12 = vcmask 7168  }
  0xa3   : > { %v776_v32 = vpop.permute.xlu1 %775 }
  0xa4   : > { %vm778_vm13 = vcmp.eq.s32.totalorder %v593_v23, %v776_v32 }
  0xa5   : > { %v1153_v34 = vsel %vm778_vm13, 1.0, %v1228_v17  ;;  %vm1028_vm13 = vcmask 0  }
  0xa6   : > { %v1362_v35 = vpack.c.bf16 %v1153_v34, %v1152_v33  ;;  %v1154_v33 = vsel %vm788_vm4, 1.0, %v1228_v17 }
  0xa7   : > { %v791_v39 = vpack.c.bf16 %v1154_v33, %v1154_v33 }
  0xa8   : > { %1155 = vmatmul.msk.bf16.vlgmr.msra.gmra.mxu2 %vm792_vm14, %v1362_v35 }
 0x11f   : > { %v670_v41 = vpop.f32.mrf.mxu0 }
 0x120   : > { %v671_v42 = vadd.f32 %v1187_v40, %v670_v41 }
 0x122   : > { %v675_v43 = vmul.f32 %v671_v42, %v671_v42 }
 0x124   : > { %v677_v44 = vmul.f32 %v675_v43, %v671_v42 }
 0x126   : > { %v679_v45 = vmul.f32 0.044715, %v677_v44 }
 0x127   : > { %v672_v46 = vpop.f32.mrf.mxu0 }
 0x128   : > { %v681_v47 = vadd.f32 %v679_v45, %v671_v42  ;;  %v673_v48 = vadd.f32 %v1187_v40, %v672_v46 }
 0x12a   : > { %v676_v49 = vmul.f32 %v673_v48, %v673_v48  ;;  %v683_v50 = vmul.f32 0.7978846, %v681_v47 }
 0x12b   : > { %v813_v15 = vpop.f32.mrf.mxu2 }
 0x12c   : > { %v678_v51 = vmul.f32 %v676_v49, %v673_v48  ;;  %1190 = vtanh.f32 %v683_v50 }
 0x12e   : > { %v680_v52 = vmul.f32 0.044715, %v678_v51 }
 0x130   : > { %v682_v53 = vadd.f32 %v680_v52, %v673_v48  ;;  %v942_v52 = vstv %s941_s15 }
 0x131   : > { %vm943_vm11 = vcmp.eq.s32.totalorder %v785_v18, %v942_v52 }
 0x132   : > { %v1191_v54 = vpop.eup %1190  ;;  %v684_v55 = vmul.f32 0.7978846, %v682_v53 }
 0x133   : > { %v687_v56 = vadd.f32 1.0, %v1191_v54  ;;  %v815_v34 = vpop.f32.mrf.mxu2 }
 0x134   : > { %1192 = vtanh.f32 %v684_v55 }
 0x135   : > { %v689_v57 = vmul.f32 0.5, %v687_v56 }
 0x137   : > { %v691_v58 = vmul.f32 %v689_v57, %v671_v42 }
 0x139   : > { %1148 = vmatmul.msk.f32.vlgmr.msra.gmra.mxu1 %vm701_vm15, %v691_v58 }
 0x13a   : > { %v1193_v59 = vpop.eup %1192 }
 0x13b   : > { %v688_v60 = vadd.f32 1.0, %v1193_v59 }
 0x13d   : > { %v690_v61 = vmul.f32 0.5, %v688_v60 }
 0x13f   : > { %v692_v62 = vmul.f32 %v690_v61, %v673_v48 }
 0x141   : > { %1149 = vmatmul.msk.f32.gmra.mxu1 %vm701_vm15, %v692_v62  ;;  %v979_v62 = vld [vmem:[%s1463_s14 + $0x18] sm:$0xff] }
 0x1b6   : > { %v725_v0 = vpop.f32.mrf.mxu1 }
 0x1b7   : > { %v726_v1 = vadd.f32 %v1188_v63, %v725_v0  ;;  %v977_v0 = vld [vmem:[%s1463_s14 + $0x8] sm:$0xff] }
 0x1b9   : > { %v1150_v2 = vmul.f32 -1.442695, %v726_v1  ;;  %v976_v1 = vld [vmem:[%s1463_s14] sm:$0xff] }
 0x1bb   : > { %1194 = vpow2.f32 %v1150_v2  ;;  %v957_v2 = vld [vmem:[%s1460_s11 + $0x18] sm:$0xff] }
 0x1be   : > { %v728_v3 = vpop.f32.mrf.mxu1 }
 0x1bf   : > { %v729_v4 = vadd.f32 %v1188_v63, %v728_v3  ;;  %v978_v63 = vld [vmem:[%s1463_s14 + $0x10] sm:$0xff] }
 0x1c0   : > { %v956_v3 = vld [vmem:[%s1460_s11 + $0x10] sm:$0xff] }
 0x1c1   : > { %v1195_v5 = vpop.eup %1194  ;;  %v1151_v6 = vmul.f32 -1.442695, %v729_v4  ;;  %v955_v4 = vld [vmem:[%s1460_s11 + $0x8] sm:$0xff] }
 0x1c2   : > { %v737_v7 = vadd.f32 1.0, %v1195_v5  ;;  %v958_v5 = vld [vmem:[%s1461_s12] sm:$0x1] }
 0x1c3   : > { %1196 = vpow2.f32 %v1151_v6  ;;  %v954_v6 = vld [vmem:[%s1460_s11] sm:$0xff] }
 0x1c4   : > { %1198 = vrcp.f32 %v737_v7  ;;  %vm744_vm1 = vweird.f32 %v737_v7  ;;  %v750_v24 = vand.u32 2147483648, %v737_v7  ;;  %v748_v27 = vand.u32 2147483647, %v737_v7 }
 0x1c6   : > { %v751_v31 = vor.u32 1.1754944e-38, %v750_v24  ;;  %vm749_vm8 = vcmp.eq.f32.partialorder %v748_v27, 8.507059e+37 }
 0x1c9   : > { %v1197_v8 = vpop.eup %1196 }
 0x1ca   : > { %v1199_v9 = vpop.eup %1198  ;;  %v738_v10 = vadd.f32 1.0, %v1197_v8  ;;  %v965_v8 = vld [vmem:[%s1462_s13] sm:$0x1] }
 0x1cb   : > { %v740_v11 = vmul.f32 %v1199_v9, %v737_v7  ;;  %vm745_vm0 = vweird.f32 %v1199_v9  ;;  %v953_v7 = vld [vmem:[%s588_s18] sm:$0x1] }
 0x1cc   : > { %1200 = vrcp.f32 %v738_v10  ;;  %v765_v23 = vand.u32 2147483648, %v738_v10  ;;  %v763_v26 = vand.u32 2147483647, %v738_v10  ;;  %vm1388_vm3 = vmor %vm744_vm1, %vm745_vm0  ;;  %vm759_vm5 = vweird.f32 %v738_v10 }
 0x1cd   : > { %v741_v12 = vsub.f32 1.0, %v740_v11 }
 0x1ce   : > { %v766_v30 = vor.u32 1.1754944e-38, %v765_v23  ;;  %vm764_vm7 = vcmp.eq.f32.partialorder %v763_v26, 8.507059e+37 }
 0x1cf   : > { %v742_v13 = vmul.f32 %v1199_v9, %v741_v12 }
 0x1d1   : > { %v743_v22 = vadd.f32 %v1199_v9, %v742_v13 }
 0x1d2   : > { %v1201_v14 = vpop.eup %1200 }
 0x1d3   : > { %v755_v16 = vmul.f32 %v1201_v14, %v738_v10  ;;  %vm760_vm2 = vweird.f32 %v1201_v14  ;;  %v747_v20 = vsel %vm1388_vm3, %v1199_v9, %v743_v22 }
 0x1d4   : > { %vm761_vm6 = vmor %vm759_vm5, %vm760_vm2  ;;  %v752_v37 = vsel %vm749_vm8, %v751_v31, %v747_v20 }
 0x1d5   : > { %v756_v21 = vsub.f32 1.0, %v755_v16  ;;  %v814_v40 = vadd.f32 %v813_v15, %v752_v37 }
 0x1d7   : > { %v757_v25 = vmul.f32 %v1201_v14, %v756_v21 }
 0x1d9   : > { %v758_v29 = vadd.f32 %v1201_v14, %v757_v25  ;;  %v1026_v25 = vld [vmem:[#allocation5] sm:$0x1] }
 0x1db   : > { %v762_v32 = vsel %vm761_vm6, %v1201_v14, %v758_v29 }
 0x1dc   : > { %v767_v36 = vsel %vm764_vm7, %v766_v30, %v762_v32 }
 0x1dd   : > { %v816_v38 = vadd.f32 %v815_v34, %v767_v36 }
 0x1df   : > { %1156 = vmatpush.msk.msra.mxu3 %vm822_vm9, %v816_v38 }
 0x1e1   : > { %841 = vmatpush.msra.mxu3 %v814_v40 }
 0x1e2   : > { %1157 = vmatmul.msk.bf16.vlgmr.msra.gmra.mxu3 %vm818_vm10, %v791_v39 }
 0x265   : > { %v843_v41 = vpop.f32.mrf.mxu3 }
 0x266   : > { %862 = vmatpush.msrb.mxu2 %v843_v41 }
 0x267   : > { %1158 = vmatmul.msk.bf16.vlgmr.msrb.gmra.mxu2 %vm792_vm14, %v1362_v35 }
 0x268   : > { %995 = vmatpush.msra.mxu2 %v979_v62 }
 0x26a   : > { %996 = vmatpush.msra.mxu2 %v978_v63 }
 0x26c   : > { %997 = vmatpush.msra.mxu2 %v977_v0 }
 0x26d   : > { %v845_v42 = vpop.f32.mrf.mxu3 }
 0x26e   : > { %998 = vmatpush.msra.mxu2 %v976_v1 }
 0x2ea   : > { %v864_v17 = vpop.f32.mrf.mxu2 }
 0x2eb   : > { %v865_v45 = vadd.f32 %v864_v17, %v752_v37 }
 0x2f2   : > { %v866_v43 = vpop.f32.mrf.mxu2 }
 0x2f3   : > { %v867_v44 = vadd.f32 %v866_v43, %v767_v36 }
 0x2f5   : > { %1159 = vmatpush.msk.msrb.mxu0 %vm822_vm9, %v867_v44 }
 0x2f7   : > { %887 = vmatpush.msrb.mxu0 %v865_v45 }
 0x2f8   : > { %1160 = vmatmul.msk.bf16.vlgmr.msrb.gmra.mxu0 %vm818_vm10, %v791_v39 }
 0x2f9   : > { %1018 = vmatpush.msra.mxu0 %v957_v2 }
 0x2fb   : > { %1019 = vmatpush.msra.mxu0 %v956_v3 }
 0x2fd   : > { %1020 = vmatpush.msra.mxu0 %v955_v4 }
 0x2ff   : > { %1021 = vmatpush.msra.mxu0 %v954_v6 }
 0x308   : > { %1166 = vmatmul.msk.f32.vlgmr.msra.gmra.mxu0 %vm701_vm15, %v953_v7 }
 0x375   : > { %v889_v46 = vpop.f32.mrf.mxu0 }
 0x376   : > { %908 = vmatpush.msrb.mxu3 %v889_v46 }
 0x377   : > { %1161 = vmatmul.msk.bf16.vlgmr.msrb.gmra.mxu3 %vm792_vm14, %v1362_v35 }
 0x37d   : > { %v891_v47 = vpop.f32.mrf.mxu0 }
 0x385   : > { %v1023_v23 = vpop.f32.mrf.mxu0 }
 0x3fa   : > { %v910_v48 = vpop.f32.mrf.mxu3 }
 0x3fb   : > { %v911_v51 = vadd.f32 %v910_v48, %v752_v37 }
 0x402   : > { %v912_v49 = vpop.f32.mrf.mxu3 }
 0x403   : > { %v913_v50 = vadd.f32 %v912_v49, %v767_v36 }
 0x405   : > { %1162 = vmatpush.msk.msrb.mxu1 %vm822_vm9, %v913_v50 }
 0x407   : > { %933 = vmatpush.msrb.mxu1 %v911_v51 }
 0x408   : > { %1163 = vmatmul.msk.bf16.vlgmr.msrb.gmra.mxu1 %vm818_vm10, %v791_v39 }
 0x485   : > { %v935_v53 = vpop.f32.mrf.mxu1 }
 0x486   : > { %v944_v54 = vsel %vm943_vm11, %v935_v53, 0.0 }
 0x487   : > { %v946_v55 = vsel %vm945_vm12, %v944_v54, 0.0 }
 0x488   : > { %v947_v35 = vrot.slane %v946_v55, 4 }
 0x48a   : > { %v948_v56 = vadd.f32 %v947_v35, %v946_v55 }
 0x48c   : > { %v949_v57 = vrot.slane %v948_v56, 2 }
 0x48d   : > { %v937_v58 = vpop.f32.mrf.mxu1 }
 0x48e   : > { %v950_v59 = vadd.f32 %v949_v57, %v948_v56 }
 0x490   : > { %v951_v60 = vrot.slane %v950_v59, 1 }
 0x492   : > { %v952_v61 = vadd.f32 %v951_v60, %v950_v59 }
 0x494   : > { %961 = vperm.xlu2 %1186, %v952_v61  }
 0x4ee   : > { %v962_v9 = vpop.permute.xlu2 %961 }
 0x4ef   : > { %v964_v10 = vmul.f32 %v962_v9, %v958_v5 }
 0x4f1   : > { %v966_v11 = vadd.f32 %v965_v8, %v964_v10 }
 0x4f3   : > { %v967_v12 = vmul.f32 %v966_v11, %v966_v11 }
 0x4f5   : > { %v968_v13 = vmul.f32 %v967_v12, %v966_v11 }
 0x4f7   : > { %v969_v14 = vmul.f32 0.044715, %v968_v13 }
 0x4f9   : > { %v970_v15 = vadd.f32 %v969_v14, %v966_v11 }
 0x4fb   : > { %v971_v16 = vmul.f32 0.7978846, %v970_v15 }
 0x4fd   : > { %1202 = vtanh.f32 %v971_v16 }
 0x503   : > { %v1203_v18 = vpop.eup %1202 }
 0x504   : > { %v973_v19 = vadd.f32 1.0, %v1203_v18 }
 0x506   : > { %v974_v21 = vmul.f32 0.5, %v973_v19 }
 0x508   : > { %v975_v22 = vmul.f32 %v974_v21, %v966_v11 }
 0x50a   : > { %1165 = vmatmul.msk.f32.vlgmr.msra.gmra.mxu2 %vm701_vm15, %v975_v22 }
 0x58d   : > { %v1000_v24 = vpop.f32.mrf.mxu2 }
 0x58e   : > { %v1024_v26 = vadd.f32 %v1023_v23, %v1000_v24 }
 0x590   : > { %v1027_v27 = vadd.f32 %v1026_v25, %v1024_v26 }
 0x592   : > { %1029 = vst.msk [vmem:[%s591_s26] sm:$0x1] %vm1028_vm13, %v1027_v27 }
 0x593 PF: > { %s38_s29 = sadd.s32 1, %s1224_s29  }
 0x594   : > { %p35_p4 = scmp.ge.s32.totalorder %s38_s29, 4  }
 0x596   :  { %37 = sbr.rel (!%p35_p4) target bundleno = 15 (0xf), region = 125 }

</bundles_post_ra>
